<compile_context>
chip_gen: v5e
topology: v5e:2x2
jax: 0.10.0
libtpu: 0.0.40
codegen_flags: <defaults>
</compile_context>

<pallas_src>
import numpy as np
import jax
import jax.numpy as jnp
from jax.experimental import pallas as pl
from jax.experimental.pallas import tpu as pltpu

# ----------------------------- configuration --------------------------------
CONTEXT_LENGTH = 16          # L
PREDICTION_LENGTH = 8        # H
OUTPUT_SIZE = (1,)           # len() = n_out, sum() = sum_out
ENCODER_COV = 2
DECODER_COV = 2
STATIC_SIZE = 3
STATIC_HIDDEN = 4
N_THETA = PREDICTION_LENGTH  # identity basis => n_theta == prediction_length
HIDDEN_SIZE = (32, 32)
POOLING_SIZES = 4
POOLING_MODE = "max"         # 'max' or 'average'
ACTIVATION = "ReLU"
BATCH = 4

LANE = 128                   # TPU lane width; all layer dims are padded to this
MXU_DTYPE = jnp.bfloat16     # matmul operand dtype (f32 accumulate); jnp.float32 to disable

N_OUT = len(OUTPUT_SIZE)
SUM_OUT = sum(OUTPUT_SIZE)
CTX_POOLED = int(np.ceil(CONTEXT_LENGTH / POOLING_SIZES))
# TODO(synk): MaxPool1d/AvgPool1d ceil_mode ragged tail not handled; we require exact divisibility.
assert CONTEXT_LENGTH % POOLING_SIZES == 0
MLP_IN = (CTX_POOLED * N_OUT + CONTEXT_LENGTH * ENCODER_COV
          + PREDICTION_LENGTH * DECODER_COV + STATIC_HIDDEN)
MLP_OUT = CONTEXT_LENGTH * N_OUT + N_THETA * SUM_OUT

_ACT = {
    "ReLU": lambda x: jnp.maximum(x, 0.0),
    "Tanh": jnp.tanh,
    "Sigmoid": jax.nn.sigmoid,
    "Softplus": jax.nn.softplus,
    "SELU": jax.nn.selu,
    "LeakyReLU": lambda x: jnp.where(x >= 0, x, 0.01 * x),
}
# TODO(synk): PReLU (learnable slope) not implemented.

# Activations that map 1.0 -> 1.0 (the constant-1 bias lane propagates through them unchanged).
_ONES_PRESERVING = {"ReLU", "LeakyReLU"}


def _round_up(x, m):
    return ((x + m - 1) // m) * m


# ------------------------------- Pallas kernel -------------------------------
def _make_mlp_kernel(activation, n_layers, mxu_dtype):
    act = _ACT[activation]
    reinject_ones = activation not in _ONES_PRESERVING   # re-set the bias lane after non-1-preserving acts

    def kernel(feat_ref, w_ref, out_ref):
        # feat_ref: (TB, LANE) MXU_DTYPE  -- padded lane-dense features, lane LANE-1 == 1 (bias lane)
        # w_ref:    (n_layers, LANE, LANE) MXU_DTYPE -- zero-padded weights, row LANE-1 == folded bias
        # out_ref:  (TB, LANE) f32        -- lane-dense theta slab
        h = feat_ref[...]
        for i in range(n_layers):                                   # static, fully unrolled
            z = jnp.dot(h, w_ref[i],
                        preferred_element_type=jnp.float32)         # one MXU pass; bias folded in
            if i < n_layers - 1:
                z = act(z)                                           # f32 activation (VPU)
                if reinject_ones:
                    lane = jax.lax.broadcasted_iota(jnp.int32, z.shape, 1)
                    z = jnp.where(lane == LANE - 1, 1.0, z)
                h = z.astype(mxu_dtype)
            else:
                out_ref[...] = z                                     # lane-dense f32 store

    return kernel


# --------------------------- one-time parameter prep -------------------------
def prepare_kernel_params(params):
    """Pack all MLP weights + biases into ONE padded lane-dense slab (done once, not per call)."""
    dims = [MLP_IN] + list(HIDDEN_SIZE) + [MLP_OUT]
    # TODO(synk): layer dims > 127 would need K/N tiling inside the kernel (lane 127 holds the bias).
    assert max(dims) <= LANE - 1
    n_layers = len(dims) - 1
    w_slab = np.zeros((n_layers, LANE, LANE), np.float32)
    for i, (w, b) in enumerate(zip(params["mlp_w"], params["mlp_b"])):
        fi, fo = w.shape
        w_slab[i, :fi, :fo] = np.asarray(w)
        w_slab[i, LANE - 1, :fo] = np.asarray(b).reshape(-1)      # bias folded into row 127
        if i < n_layers - 1:
            w_slab[i, LANE - 1, LANE - 1] = 1.0                   # propagate the constant-1 lane
    return {
        "w_slab": jnp.asarray(w_slab, MXU_DTYPE),
        "static_w": params["static_w"],
        "static_b": params["static_b"],
        "n_layers": n_layers,
    }


# ------------------------------- wrapper --------------------------------------
def nhits_block_forward(prepped, encoder_y, encoder_x_t, decoder_x_t, x_s):
    B, L, C = encoder_y.shape
    p, Lp = POOLING_SIZES, CTX_POOLED
    n_layers = prepped["n_layers"]

    # --- cheap glue (single fused XLA prologue): pooling, static encoder, feature concat ---
    y = encoder_y.reshape(B, Lp, p, C)                                  # window split, no transpose
    pooled = jnp.max(y, axis=2) if POOLING_MODE == "max" else jnp.mean(y, axis=2)   # (B, Lp, C)
    # static encoder: Dropout(p=0.5) is identity at inference; K=3 contraction stays off the MXU
    s = jnp.maximum(x_s @ prepped["static_w"] + prepped["static_b"], 0.0)
    feat = jnp.concatenate(
        [pooled.reshape(B, Lp * C),            # time-major, channel-minor == torch flatten order
         encoder_x_t.reshape(B, -1),
         decoder_x_t.reshape(B, -1),
         s], axis=1)                                                    # (B, MLP_IN)

    # --- batch tiling + lane padding (bf16 activations -> 16-row alignment) ---
    align = 16 if MXU_DTYPE == jnp.bfloat16 else 8
    TB_CAP = 1024                               # large tiles amortize the ~0.35us per-step cost
    B_al = _round_up(B, align)
    if B_al >= 256:
        # >= 2 grid steps so dimension_semantics=("parallel",) can shard across v7x's two TCs
        TB = min(TB_CAP, _round_up((B_al + 1) // 2, align))
    else:
        TB = min(TB_CAP, B_al)                  # tiny batch: one grid step, no splitting overhead
    B_pad = _round_up(B, TB)

    feat_p = jnp.zeros((B_pad, LANE), MXU_DTYPE)
    feat_p = feat_p.at[:B, :MLP_IN].set(feat.astype(MXU_DTYPE))
    feat_p = feat_p.at[:, LANE - 1].set(1.0)                            # constant-1 bias lane

    itemsize = jnp.dtype(MXU_DTYPE).itemsize
    cost = pl.CostEstimate(
        flops=2 * B_pad * n_layers * LANE * LANE,
        transcendentals=0,
        bytes_accessed=(B_pad * LANE * itemsize              # activations in (bf16)
                        + n_layers * LANE * LANE * itemsize  # weight slab (resident)
                        + B_pad * LANE * 4),                 # f32 theta out
    )

    kernel = _make_mlp_kernel(ACTIVATION, n_layers, MXU_DTYPE)
    theta_p = pl.pallas_call(
        kernel,
        out_shape=jax.ShapeDtypeStruct((B_pad, LANE), jnp.float32),
        grid=(B_pad // TB,),
        in_specs=[
            pl.BlockSpec((TB, LANE), lambda i: (i, 0)),                 # batch-tiled activations
            pl.BlockSpec((n_layers, LANE, LANE), lambda i: (0, 0, 0)),  # weights resident
        ],
        out_specs=pl.BlockSpec((TB, LANE), lambda i: (i, 0)),
        compiler_params=pltpu.CompilerParams(
            dimension_semantics=("parallel",)),                         # v7x: shard batch over 2 TCs
        cost_estimate=cost,
    )(feat_p, prepped["w_slab"])

    theta = theta_p[:B, :MLP_OUT]                                       # drop lane/batch padding

    # --- theta split + basis + output layout (pure glue) ---
    backcast_theta = theta[:, : L * N_OUT].reshape(-1, L)
    forecast_theta = theta[:, L * N_OUT:].reshape(-1, N_THETA)
    # TODO(synk): `basis` is an injected nn.Module; IdentityBasis semantics used (n_theta == prediction_length).
    backcast = backcast_theta.reshape(-1, N_OUT, L).transpose(0, 2, 1)                    # (B, L, n_out)
    forecast = forecast_theta.reshape(-1, SUM_OUT, PREDICTION_LENGTH).transpose(0, 2, 1)  # (B, H, sum_out)
    return backcast, forecast


# ------------------------------- pure-JAX reference ---------------------------
def reference_forward(params, encoder_y, encoder_x_t, decoder_x_t, x_s):
    B, L, C = encoder_y.shape
    act = _ACT[ACTIVATION]
    y = jnp.transpose(encoder_y, (0, 2, 1)).reshape(B, C, CTX_POOLED, POOLING_SIZES)
    pooled = y.max(-1) if POOLING_MODE == "max" else y.mean(-1)
    feat = jnp.transpose(pooled, (0, 2, 1)).reshape(B, -1)
    feat = jnp.concatenate([feat, encoder_x_t.reshape(B, -1), decoder_x_t.reshape(B, -1)], axis=1)
    s = jnp.maximum(x_s @ params["static_w"] + params["static_b"], 0.0)
    feat = jnp.concatenate([feat, s], axis=1)
    h = feat
    for i, (w, b) in enumerate(zip(params["mlp_w"], params["mlp_b"])):
        h = h @ w + b
        if i < len(params["mlp_w"]) - 1:
            h = act(h)
    theta = h
    backcast = theta[:, : L * N_OUT].reshape(-1, L).reshape(-1, N_OUT, L).transpose(0, 2, 1)
    forecast = theta[:, L * N_OUT:].reshape(-1, N_THETA).reshape(-1, SUM_OUT, PREDICTION_LENGTH).transpose(0, 2, 1)
    return backcast, forecast


# ------------------------------- parameter init -------------------------------
def init_params(key):
    def linear(k, fi, fo):
        k1, k2 = jax.random.split(k)
        bound = 1.0 / np.sqrt(fi)
        w = jax.random.uniform(k1, (fi, fo), jnp.float32, -bound, bound)
        b = jax.random.uniform(k2, (1, fo), jnp.float32, -bound, bound)
        return w, b

    dims = [MLP_IN] + list(HIDDEN_SIZE) + [MLP_OUT]
    keys = jax.random.split(key, 1 + len(dims) - 1)
    static_w, static_b = linear(keys[0], STATIC_SIZE, STATIC_HIDDEN)
    mlp_w, mlp_b = [], []
    for i in range(len(dims) - 1):
        w, b = linear(keys[1 + i], dims[i], dims[i + 1])
        mlp_w.append(w)
        mlp_b.append(b)
    return {"static_w": static_w, "static_b": static_b, "mlp_w": mlp_w, "mlp_b": mlp_b}


# ----------------------------------- main --------------------------------------
if __name__ == "__main__":
    key = jax.random.PRNGKey(0)
    kp, k1, k2, k3, k4 = jax.random.split(key, 5)
    params = init_params(kp)
    prepped = prepare_kernel_params(params)        # one-time weight packing (not per call)

    # bf16 MXU operands + bf16-folded bias (f32 accumulate) => looser tolerance vs pure-f32 reference.
    tol = 1e-5 if MXU_DTYPE == jnp.float32 else 5e-2

    # --- small-batch check (single grid step) ---
    encoder_y = jax.random.normal(k1, (BATCH, CONTEXT_LENGTH, N_OUT), jnp.float32)
    encoder_x_t = jax.random.normal(k2, (BATCH, CONTEXT_LENGTH, ENCODER_COV), jnp.float32)
    decoder_x_t = jax.random.normal(k3, (BATCH, PREDICTION_LENGTH, DECODER_COV), jnp.float32)
    x_s = jax.random.normal(k4, (BATCH, STATIC_SIZE), jnp.float32)

    backcast, forecast = nhits_block_forward(prepped, encoder_y, encoder_x_t, decoder_x_t, x_s)
    jax.block_until_ready((backcast, forecast))

    ref_b, ref_f = reference_forward(params, encoder_y, encoder_x_t, decoder_x_t, x_s)
    assert backcast.shape == (BATCH, CONTEXT_LENGTH, N_OUT)
    assert forecast.shape == (BATCH, PREDICTION_LENGTH, SUM_OUT)
    np.testing.assert_allclose(np.asarray(backcast), np.asarray(ref_b), rtol=tol, atol=tol)
    np.testing.assert_allclose(np.asarray(forecast), np.asarray(ref_f), rtol=tol, atol=tol)

    # --- larger-batch check exercising the >=2-step grid (two-TensorCore path on v7x) ---
    B2 = 300
    kb1, kb2, kb3, kb4 = jax.random.split(jax.random.PRNGKey(1), 4)
    ey2 = jax.random.normal(kb1, (B2, CONTEXT_LENGTH, N_OUT), jnp.float32)
    ex2 = jax.random.normal(kb2, (B2, CONTEXT_LENGTH, ENCODER_COV), jnp.float32)
    dx2 = jax.random.normal(kb3, (B2, PREDICTION_LENGTH, DECODER_COV), jnp.float32)
    xs2 = jax.random.normal(kb4, (B2, STATIC_SIZE), jnp.float32)
    b2, f2 = nhits_block_forward(prepped, ey2, ex2, dx2, xs2)
    jax.block_until_ready((b2, f2))
    rb2, rf2 = reference_forward(params, ey2, ex2, dx2, xs2)
    np.testing.assert_allclose(np.asarray(b2), np.asarray(rb2), rtol=tol, atol=tol)
    np.testing.assert_allclose(np.asarray(f2), np.asarray(rf2), rtol=tol, atol=tol)

    print("KERNEL_OK")
</pallas_src>

<mosaic_0001>
module attributes {stable_mosaic.version = 11 : i64} {
  func.func @kernel(%arg0: i32, %arg1: memref<16x128xbf16, #tpu.memory_space<vmem>>, %arg2: memref<3x128x128xbf16, #tpu.memory_space<vmem>>, %arg3: memref<16x128xf32, #tpu.memory_space<vmem>>) attributes {dimension_semantics = [#tpu.dimension_semantics<parallel>], iteration_bounds = array<i64: 1>, scalar_prefetch = 0 : i64, scratch_operands = 0 : i64, tpu.core_type = #tpu.core_type<tc>, window_params = [{transform_indices = @transform_0, window_bounds = array<i64: 16, 128>}, {pipeline_mode = #tpu.pipeline_mode<synchronous>, transform_indices = @transform_1, window_bounds = array<i64: 3, 128, 128>}, {transform_indices = @transform_2, window_bounds = array<i64: 16, 128>}]} {
    %c0 = arith.constant 0 : index
    %c0_0 = arith.constant 0 : index
    %0 = vector.load %arg1[%c0, %c0_0] : memref<16x128xbf16, #tpu.memory_space<vmem>>, vector<16x128xbf16>
    %c0_1 = arith.constant 0 : index
    %c0_2 = arith.constant 0 : index
    %c0_3 = arith.constant 0 : index
    %1 = vector.load %arg2[%c0_1, %c0_2, %c0_3] : memref<3x128x128xbf16, #tpu.memory_space<vmem>>, vector<1x128x128xbf16>
    %2 = vector.shape_cast %1 : vector<1x128x128xbf16> to vector<128x128xbf16>
    %cst = arith.constant dense<0.000000e+00> : vector<16x128xf32>
    %3 = tpu.matmul %0, %2, %cst {dimension_numbers = #tpu.dot_dimension_numbers<[1], [0], [0], [1], [0, 0, 1, 1], [], []>} : vector<16x128xbf16>, vector<128x128xbf16>, vector<16x128xf32> -> vector<16x128xf32>
    %cst_4 = arith.constant 0.000000e+00 : f32
    %4 = vector.broadcast %cst_4 : f32 to vector<16x128xf32>
    %5 = arith.maximumf %3, %4 : vector<16x128xf32>
    %6 = arith.truncf %5 : vector<16x128xf32> to vector<16x128xbf16>
    %c1 = arith.constant 1 : index
    %c0_5 = arith.constant 0 : index
    %c0_6 = arith.constant 0 : index
    %7 = vector.load %arg2[%c1, %c0_5, %c0_6] : memref<3x128x128xbf16, #tpu.memory_space<vmem>>, vector<1x128x128xbf16>
    %8 = vector.shape_cast %7 : vector<1x128x128xbf16> to vector<128x128xbf16>
    %cst_7 = arith.constant dense<0.000000e+00> : vector<16x128xf32>
    %9 = tpu.matmul %6, %8, %cst_7 {dimension_numbers = #tpu.dot_dimension_numbers<[1], [0], [0], [1], [0, 0, 1, 1], [], []>} : vector<16x128xbf16>, vector<128x128xbf16>, vector<16x128xf32> -> vector<16x128xf32>
    %cst_8 = arith.constant 0.000000e+00 : f32
    %10 = vector.broadcast %cst_8 : f32 to vector<16x128xf32>
    %11 = arith.maximumf %9, %10 : vector<16x128xf32>
    %12 = arith.truncf %11 : vector<16x128xf32> to vector<16x128xbf16>
    %c2 = arith.constant 2 : index
    %c0_9 = arith.constant 0 : index
    %c0_10 = arith.constant 0 : index
    %13 = vector.load %arg2[%c2, %c0_9, %c0_10] : memref<3x128x128xbf16, #tpu.memory_space<vmem>>, vector<1x128x128xbf16>
    %14 = vector.shape_cast %13 : vector<1x128x128xbf16> to vector<128x128xbf16>
    %cst_11 = arith.constant dense<0.000000e+00> : vector<16x128xf32>
    %15 = tpu.matmul %12, %14, %cst_11 {dimension_numbers = #tpu.dot_dimension_numbers<[1], [0], [0], [1], [0, 0, 1, 1], [], []>} : vector<16x128xbf16>, vector<128x128xbf16>, vector<16x128xf32> -> vector<16x128xf32>
    %c0_12 = arith.constant 0 : index
    %c0_13 = arith.constant 0 : index
    %16 = vector.load %arg3[%c0_12, %c0_13] : memref<16x128xf32, #tpu.memory_space<vmem>>, vector<16x128xf32>
    tpu.vector_store %arg3[%c0_12, %c0_13], %15 {strides = array<i32>} : memref<16x128xf32, #tpu.memory_space<vmem>>, vector<16x128xf32>,
    return
  }
  func.func @transform_0(%arg0: i32) -> (i32, i32) {
    %c0_i32 = arith.constant 0 : i32
    %c0_i32_0 = arith.constant 0 : i32
    return %arg0, %c0_i32 : i32, i32
  }
  func.func @transform_1(%arg0: i32) -> (i32, i32, i32) {
    %c0_i32 = arith.constant 0 : i32
    %c0_i32_0 = arith.constant 0 : i32
    %c0_i32_1 = arith.constant 0 : i32
    %c0_i32_2 = arith.constant 0 : i32
    return %c0_i32, %c0_i32_0, %c0_i32_1 : i32, i32, i32
  }
  func.func @transform_2(%arg0: i32) -> (i32, i32) {
    %c0_i32 = arith.constant 0 : i32
    %c0_i32_0 = arith.constant 0 : i32
    return %arg0, %c0_i32 : i32, i32
  }
}

</mosaic_0001>

<bundles_post_ra>
// kernel: tpu_custom_call.1
= control target key start
LH: loop header
LB: loop body
LE: loop exit
PB: predicated region body
PF: predicated region fallthrough
CT: control target
= control target key end

     0   :  { %7 = vsyncpa [#allocation3], 0  ;;  %s557_s0 = inlined_call_operand.hbm [shape: bf16[16,128], index: 0, kind: input, shape index: {}]   ;;  %s558_s1 = inlined_call_operand.hbm [shape: bf16[3,128,128], index: 1, kind: input, shape index: {}]   ;;  %s559_s2 = inlined_call_operand.hbm [shape: f32[16,128], index: 2, kind: output, shape index: {}]  }
   0x1   :  { %8 = vsyncpa [#allocation6], 0 }
   0x2   :  { %9 = vsyncpa [#allocation4], 0  ;;  %s14_s11 = sshll.u32 %s557_s0, 4  ;;  %s526_s12 = smov [#allocation2]   ;;  %s15_s11 = int_to_ptr.hbm [resolvable:$true] %s14_s11 }
   0x3   :  { %s16_s13 = sshll.u32 %s526_s12, 4  ;;  %s27_s16 = sshll.u32 %s558_s1, 4  ;;  %s17_s13 = int_to_ptr.vmem [resolvable:$true] %s16_s13  ;;  %s28_s16 = int_to_ptr.hbm [resolvable:$true] %s27_s16 }
   0x4   :  { %s527_s17 = smov 64   ;;  %s528_s18 = smov 4  }
   0x5   :  { %22 = dma.hbm_to_vmem [thread:$0]  %s15_s11, 128, %s17_s13, [#allocation3], %s527_s17, %s527_s17, %s528_s18  }
   0x6   :  { %s529_s19 = smov [#allocation5]  }
   0x7   :  { %s29_s20 = sshll.u32 %s529_s19, 4  ;;  %s30_s20 = int_to_ptr.vmem [resolvable:$true] %s29_s20 }
   0x8   :  { %35 = dma.hbm_to_vmem [thread:$0]  %s28_s16, 3072, %s30_s20, [#allocation6], %s527_s17, %s527_s17, %s528_s18  }
   0x9   :  { %520 = dma.done.wait [#allocation3], 128  }
   0xa   :  { %521 = vsyncadd [#allocation3], 4294967168 }
   0xb   :  { %522 = dma.done.wait [#allocation6], 3072  }
   0xc   :  { %523 = vsyncadd [#allocation6], 4294964224  ;;  %v424_v0 = vld [vmem:[#allocation5 + $0x38] sm:$0xff]  ;;  %v423_v1 = vld [vmem:[#allocation5 + $0x30] sm:$0xff]  ;;  %s530_s0 = smov [#allocation7]   ;;  %s302_s23 = sshll.u32 %s559_s2, 4  ;;  %s303_s23 = int_to_ptr.hbm [resolvable:$true] %s302_s23 }
   0xd   :  { %116 = vmatpush.bf16.msra.mxu0 %v424_v0  ;;  %v432_v2 = vld [vmem:[#allocation5 + $0x78] sm:$0xff]  ;;  %v431_v3 = vld [vmem:[#allocation5 + $0x70] sm:$0xff]  ;;  %v422_v4 = vld [vmem:[#allocation5 + $0x28] sm:$0xff]  ;;  %s300_s1 = sshll.u32 %s530_s0, 4  ;;  %s531_s24 = smov 128   ;;  %s301_s1 = int_to_ptr.vmem [resolvable:$true] %s300_s1 }
   0xe   :  { %198 = vmatpush.bf16.msra.mxu1 %v432_v2  ;;  %v430_v5 = vld [vmem:[#allocation5 + $0x68] sm:$0xff]  ;;  %v421_v6 = vld [vmem:[#allocation5 + $0x20] sm:$0xff]  ;;  %v420_v8 = vld [vmem:[#allocation5 + $0x18] sm:$0xff]  ;;  %s532_s25 = smov 8  }
   0xf   :  { %v429_v7 = vld [vmem:[#allocation5 + $0x60] sm:$0xff]  ;;  %v428_v9 = vld [vmem:[#allocation5 + $0x58] sm:$0xff]  ;;  %v419_v10 = vld [vmem:[#allocation5 + $0x10] sm:$0xff] }
  0x10   :  { %v418_v11 = vld [vmem:[#allocation5 + $0x8] sm:$0xff]  ;;  %v417_v12 = vld [vmem:[#allocation5] sm:$0xff]  ;;  %v416_v13 = vld [vmem:[#allocation2] sm:$0xff] }
  0x11   :  { %117 = vmatpush.bf16.msra.mxu0 %v423_v1  ;;  %v427_v14 = vld [vmem:[#allocation5 + $0x50] sm:$0xff]  ;;  %v426_v15 = vld [vmem:[#allocation5 + $0x48] sm:$0xff]  ;;  %v425_v16 = vld [vmem:[#allocation5 + $0x40] sm:$0xff] }
  0x12   :  { %199 = vmatpush.bf16.msra.mxu1 %v431_v3  ;;  %v440_v17 = vld [vmem:[#allocation5 + $0xb8] sm:$0xff]  ;;  %v439_v18 = vld [vmem:[#allocation5 + $0xb0] sm:$0xff]  ;;  %v438_v19 = vld [vmem:[#allocation5 + $0xa8] sm:$0xff] }
  0x13   :  { %280 = vmatpush.bf16.msra.mxu2 %v440_v17  ;;  %v437_v20 = vld [vmem:[#allocation5 + $0xa0] sm:$0xff]  ;;  %v436_v21 = vld [vmem:[#allocation5 + $0x98] sm:$0xff]  ;;  %v435_v27 = vld [vmem:[#allocation5 + $0x90] sm:$0xff] }
  0x14   :  { %v434_v28 = vld [vmem:[#allocation5 + $0x88] sm:$0xff]  ;;  %v433_v29 = vld [vmem:[#allocation5 + $0x80] sm:$0xff] }
  0x15   :  { %118 = vmatpush.bf16.msra.mxu0 %v422_v4 }
  0x16   :  { %200 = vmatpush.bf16.msra.mxu1 %v430_v5 }
  0x17   :  { %281 = vmatpush.bf16.msra.mxu2 %v439_v18 }
  0x19   :  { %119 = vmatpush.bf16.msra.mxu0 %v421_v6 }
  0x1a   :  { %201 = vmatpush.bf16.msra.mxu1 %v429_v7 }
  0x1b   :  { %282 = vmatpush.bf16.msra.mxu2 %v438_v19 }
  0x1d   :  { %120 = vmatpush.bf16.msra.mxu0 %v420_v8 }
  0x1e   :  { %202 = vmatpush.bf16.msra.mxu1 %v428_v9 }
  0x1f   :  { %283 = vmatpush.bf16.msra.mxu2 %v437_v20 }
  0x21   :  { %121 = vmatpush.bf16.msra.mxu0 %v419_v10 }
  0x22   :  { %203 = vmatpush.bf16.msra.mxu1 %v427_v14 }
  0x23   :  { %284 = vmatpush.bf16.msra.mxu2 %v436_v21 }
  0x25   :  { %122 = vmatpush.bf16.msra.mxu0 %v418_v11 }
  0x26   :  { %204 = vmatpush.bf16.msra.mxu1 %v426_v15 }
  0x27   :  { %285 = vmatpush.bf16.msra.mxu2 %v435_v27 }
  0x29   :  { %123 = vmatpush.bf16.msra.mxu0 %v417_v12 }
  0x2a   :  { %205 = vmatpush.bf16.msra.mxu1 %v425_v16 }
  0x2b   :  { %286 = vmatpush.bf16.msra.mxu2 %v434_v28 }
  0x2c   :  { %124 = vmatmul.bf16.vlgmr.msra.gmra.mxu0 %v416_v13 }
  0x2f   :  { %287 = vmatpush.bf16.msra.mxu2 %v433_v29 }
  0xa9   :  { %v125_v22 = vpop.f32.mrf.mxu0 }
  0xaa   :  { %v130_v24 = vmax.f32 %v125_v22, 0.0 }
  0xb1   :  { %v127_v23 = vpop.f32.mrf.mxu0 }
  0xb2   :  { %v131_v25 = vmax.f32 %v127_v23, 0.0 }
  0xb4   :  { %v132_v26 = vpack.c.bf16 %v131_v25, %v130_v24 }
  0xb6   :  { %206 = vmatmul.bf16.vlgmr.msra.gmra.mxu1 %v132_v26 }
 0x133   :  { %v207_v30 = vpop.f32.mrf.mxu1 }
 0x134   :  { %v212_v32 = vmax.f32 %v207_v30, 0.0 }
 0x13b   :  { %v209_v31 = vpop.f32.mrf.mxu1 }
 0x13c   :  { %v213_v33 = vmax.f32 %v209_v31, 0.0 }
 0x13e   :  { %v214_v34 = vpack.c.bf16 %v213_v33, %v212_v32 }
 0x140   :  { %288 = vmatmul.bf16.vlgmr.msra.gmra.mxu2 %v214_v34 }
 0x1c3   :  { %v289_v35 = vpop.f32.mrf.mxu2 }
 0x1c4   :  { %294 = vst [vmem:[#allocation7] sm:$0xff] %v289_v35 }
 0x1cb   :  { %v291_v36 = vpop.f32.mrf.mxu2 }
 0x1cc   :  { %295 = vst [vmem:[#allocation7 + $0x8] sm:$0xff] %v291_v36 }
 0x1cd   :  { %308 = dma.vmem_to_hbm [thread:$0]  %s301_s1, 256, %s303_s23, [#allocation4], %s531_s24, %s531_s24, %s532_s25  }
 0x1ce   :  { %524 = dma.done.wait [#allocation4], 256  }
 0x1cf   :  { %525 = vsyncadd [#allocation4], 4294967040 }
 0x1d0   :  { %313 = vsyncpa [#allocation3], 1 }
 0x1d1   :  { %314 = vsyncpa [#allocation6], 1 }
 0x1d2   :  { %315 = vsyncpa [#allocation4], 1 }

</bundles_post_ra>
